<compile_context>
chip_gen: v7x
topology: tpu7x:2x2x1
jax: 0.10.0
libtpu: 0.0.40
codegen_flags: <defaults>
</compile_context>

<pallas_src>
import functools

import jax
import jax.numpy as jnp
from jax.experimental import pallas as pl
from jax.experimental.pallas import tpu as pltpu


def _inception_kernel(xs_ref, w_ref, b_ref, o_ref, *, TH, W):
    # xs_ref: (1, 1, (TH+4)*W, 5*Cin) bf16  kx-stacked, row-flat input tile:
    #         row (r*W + c) of the ky-th row-slice holds
    #         x_pad[row_tile_start + r + ky, c + kx, i] at lane kx*Cin + i.
    # w_ref : (5, 5*Cin, Cpad)        bf16  fused weight, ky-major.
    # b_ref : (1, Cpad)               f32   fused bias (lane padded).
    # o_ref : (1, 1, TH*W, Cpad)      f32   lane-dense output tile.
    m = TH * W
    acc = jnp.dot(xs_ref[0, 0, pl.ds(0, m), :], w_ref[0],
                  preferred_element_type=jnp.float32)
    for ky in range(1, 5):                              # static unroll, 5 taps
        acc += jnp.dot(xs_ref[0, 0, pl.ds(ky * W, m), :], w_ref[ky],
                       preferred_element_type=jnp.float32)
    o_ref[0, 0] = (acc + b_ref[...]).astype(o_ref.dtype)


def _fuse_weights(params, in_channels, out_channels):
    """Embed the branch weights into one (5,5,Cin,Cout) HWIO tensor + bias."""
    Cin, Cout = in_channels, out_channels
    W = jnp.zeros((5, 5, Cin, Cout), dtype=jnp.float32)
    if out_channels == 1:
        w1, b1 = params["conv1"]                         # (1,1,Cin,1)
        W = W.at[2, 2, :, 0:1].set(w1[0, 0].reshape(Cin, 1))
        b = b1
    else:
        mid = out_channels // 3
        c5 = out_channels - 2 * mid
        (w1, b1), (w3, b3), (w5, b5) = params["conv1"], params["conv3"], params["conv5"]
        # weights stored HWIO: (kh, kw, Cin, Cbranch)
        W = W.at[2:3, 2:3, :, 0:mid].set(w1)
        W = W.at[1:4, 1:4, :, mid:2 * mid].set(w3)
        W = W.at[:, :, :, 2 * mid:2 * mid + c5].set(w5)
        b = jnp.concatenate([b1, b3, b5], axis=0)
    return W, b


def inception_block(x_nchw, params, out_channels):
    """x_nchw: (N, Cin, H, W) float32 -> (N, Cout, H, W) float32."""
    N, Cin, H, W = x_nchw.shape
    Cout = out_channels
    Cpad = max(128, ((Cout + 127) // 128) * 128)         # lane-dense output
    K5 = 5 * Cin                                         # contraction per ky

    # Row-tile size: target ~128 output rows (M) per grid step.
    TH = max(1, min(H, max(1, 128 // max(1, W))))
    while H % TH:
        TH -= 1
    NTH = H // TH
    M = TH * W

    # --- weights: fuse branches into a 5x5, fold (kx, Cin) into K, pad lanes.
    Wf, bfull = _fuse_weights(params, Cin, Cout)         # (5,5,Cin,Cout), (Cout,)
    w_k = Wf.reshape(5, K5, Cout)                        # index kx*Cin + i  (kx-major)
    w_k = jnp.pad(w_k, ((0, 0), (0, 0), (0, Cpad - Cout))).astype(jnp.bfloat16)
    bias = jnp.pad(bfull, (0, Cpad - Cout)).reshape(1, Cpad).astype(jnp.float32)

    # --- activations: NCHW -> NHWC, bf16, spatial pad=2, fold kx shifts into
    #     the channel axis, flatten rows, bake the ky halo into row tiles.
    x = jnp.transpose(x_nchw, (0, 2, 3, 1)).astype(jnp.bfloat16)   # (N,H,W,Cin)
    x = jnp.pad(x, ((0, 0), (2, 2), (2, 2), (0, 0)))               # (N,H+4,W+4,Cin)
    # xs[n, y, x, kx*Cin+i] = x_pad[n, y, x+kx, i]
    xs = jnp.concatenate([x[:, :, kx:kx + W, :] for kx in range(5)], axis=-1)
    xs = xs.reshape(N, (H + 4) * W, K5)                            # row-flat
    # overlapping row tiles with the +4 ky halo: (N, NTH, (TH+4)*W, 5*Cin)
    xs = jnp.stack([xs[:, t * TH * W:(t * TH + TH + 4) * W, :]
                    for t in range(NTH)], axis=1)

    kernel = functools.partial(_inception_kernel, TH=TH, W=W)

    out = pl.pallas_call(
        kernel,
        out_shape=jax.ShapeDtypeStruct((N, NTH, M, Cpad), jnp.float32),
        grid_spec=pltpu.PrefetchScalarGridSpec(
            num_scalar_prefetch=0,
            grid=(N, NTH),
            in_specs=[
                pl.BlockSpec((1, 1, (TH + 4) * W, K5), lambda n, t: (n, t, 0, 0)),
                pl.BlockSpec((5, K5, Cpad), lambda n, t: (0, 0, 0)),
                pl.BlockSpec((1, Cpad), lambda n, t: (0, 0)),
            ],
            out_specs=pl.BlockSpec((1, 1, M, Cpad), lambda n, t: (n, t, 0, 0)),
        ),
        compiler_params=pltpu.CompilerParams(
            dimension_semantics=("parallel", "parallel")),
    )(xs, w_k, bias)

    # slice real channels, restore (N, H, W, Cout), back to NCHW.
    out = out[..., :Cout].reshape(N, H, W, Cout)
    return jnp.transpose(out, (0, 3, 1, 2))


def init_params(key, in_channels, out_channels):
    """Deterministic synthetic init (uniform, PyTorch-like fan-in scaling)."""
    def conv_init(k, ksize, cin, cout):
        kw, kb = jax.random.split(k)
        fan_in = cin * ksize * ksize
        bound = 1.0 / (fan_in ** 0.5)
        w = jax.random.uniform(kw, (ksize, ksize, cin, cout),
                               minval=-bound, maxval=bound, dtype=jnp.float32)
        b = jax.random.uniform(kb, (cout,), minval=-bound, maxval=bound,
                               dtype=jnp.float32)
        return w, b

    params = {}
    if out_channels == 1:
        params["conv1"] = conv_init(key, 1, in_channels, 1)
    else:
        mid = out_channels // 3
        c5 = out_channels - 2 * mid
        k1, k3, k5 = jax.random.split(key, 3)
        params["conv1"] = conv_init(k1, 1, in_channels, mid)
        params["conv3"] = conv_init(k3, 3, in_channels, mid)
        params["conv5"] = conv_init(k5, 5, in_channels, c5)
    return params


def _reference(x_nchw, params, out_channels, operand_dtype=jnp.float32):
    """Pure-JAX reference (lax conv) matching the PyTorch forward.

    operand_dtype lets us build a bf16-operand / f32-accumulation reference
    that matches the kernel's MXU numerics exactly.
    """
    def conv(x, w, b, pad):
        y = jax.lax.conv_general_dilated(
            x.astype(operand_dtype), w.astype(operand_dtype),
            window_strides=(1, 1), padding=[(pad, pad), (pad, pad)],
            dimension_numbers=("NCHW", "HWIO", "NCHW"),
            preferred_element_type=jnp.float32)
        return y + b.reshape(1, -1, 1, 1)

    if out_channels == 1:
        w1, b1 = params["conv1"]
        return conv(x_nchw, w1, b1, 0)
    (w1, b1), (w3, b3), (w5, b5) = params["conv1"], params["conv3"], params["conv5"]
    return jnp.concatenate(
        [conv(x_nchw, w1, b1, 0), conv(x_nchw, w3, b3, 1), conv(x_nchw, w5, b5, 2)],
        axis=1)


if __name__ == "__main__":
    key = jax.random.PRNGKey(0)
    k_x, k_p = jax.random.split(key)

    N, Cin, H, W = 2, 4, 16, 16
    Cout = 6  # >1 so all three branches (1x1 / 3x3 / 5x5) are exercised

    x = jax.random.normal(k_x, (N, Cin, H, W), dtype=jnp.float32)
    params = init_params(k_p, Cin, Cout)

    forward = jax.jit(inception_block, static_argnums=(2,))
    out = jax.block_until_ready(forward(x, params, Cout))
    assert out.shape == (N, Cout, H, W)

    # Kernel uses bf16 MXU operands with f32 accumulation:
    #  - tight check vs a bf16-operand reference (same numerics),
    #  - loose check vs the pure-f32 reference (bf16 operand rounding only).
    ref_bf16 = _reference(x, params, Cout, operand_dtype=jnp.bfloat16)
    ref_f32 = _reference(x, params, Cout, operand_dtype=jnp.float32)
    assert jnp.allclose(out, ref_bf16, atol=1e-2, rtol=1e-2)
    assert jnp.allclose(out, ref_f32, atol=5e-2, rtol=5e-2)

    print("KERNEL_OK")
</pallas_src>

<mosaic_0001>
module attributes {stable_mosaic.version = 11 : i64} {
  func.func @_inception_kernel(%arg0: i32, %arg1: i32, %arg2: memref<1x1x192x20xbf16, #tpu.memory_space<vmem>>, %arg3: memref<5x20x128xbf16, #tpu.memory_space<vmem>>, %arg4: memref<1x128xf32, #tpu.memory_space<vmem>>, %arg5: memref<1x1x128x128xf32, #tpu.memory_space<vmem>>) attributes {dimension_semantics = [#tpu.dimension_semantics<parallel>, #tpu.dimension_semantics<parallel>], iteration_bounds = array<i64: 2, 2>, scalar_prefetch = 0 : i64, scratch_operands = 0 : i64, tpu.core_type = #tpu.core_type<tc>, window_params = [{transform_indices = @transform_0, window_bounds = array<i64: 1, 1, 192, 20>}, {pipeline_mode = #tpu.pipeline_mode<synchronous>, transform_indices = @transform_1, window_bounds = array<i64: 5, 20, 128>}, {pipeline_mode = #tpu.pipeline_mode<synchronous>, transform_indices = @transform_2, window_bounds = array<i64: 1, 128>}, {transform_indices = @transform_3, window_bounds = array<i64: 1, 1, 128, 128>}]} {
    %c0 = arith.constant 0 : index
    %c0_0 = arith.constant 0 : index
    %c0_1 = arith.constant 0 : index
    %c0_2 = arith.constant 0 : index
    %0 = vector.load %arg2[%c0, %c0_0, %c0_1, %c0_2] : memref<1x1x192x20xbf16, #tpu.memory_space<vmem>>, vector<1x1x128x20xbf16>
    %1 = vector.shape_cast %0 : vector<1x1x128x20xbf16> to vector<128x20xbf16>
    %c0_3 = arith.constant 0 : index
    %c0_4 = arith.constant 0 : index
    %c0_5 = arith.constant 0 : index
    %2 = vector.load %arg3[%c0_3, %c0_4, %c0_5] : memref<5x20x128xbf16, #tpu.memory_space<vmem>>, vector<1x20x128xbf16>
    %3 = vector.shape_cast %2 : vector<1x20x128xbf16> to vector<20x128xbf16>
    %cst = arith.constant dense<0.000000e+00> : vector<128x128xf32>
    %4 = tpu.matmul %1, %3, %cst {dimension_numbers = #tpu.dot_dimension_numbers<[1], [0], [0], [1], [0, 0, 1, 1], [], []>} : vector<128x20xbf16>, vector<20x128xbf16>, vector<128x128xf32> -> vector<128x128xf32>
    %c0_6 = arith.constant 0 : index
    %c0_7 = arith.constant 0 : index
    %c16 = arith.constant 16 : index
    %c0_8 = arith.constant 0 : index
    %5 = vector.load %arg2[%c0_6, %c0_7, %c16, %c0_8] : memref<1x1x192x20xbf16, #tpu.memory_space<vmem>>, vector<1x1x128x20xbf16>
    %6 = vector.shape_cast %5 : vector<1x1x128x20xbf16> to vector<128x20xbf16>
    %c1 = arith.constant 1 : index
    %c0_9 = arith.constant 0 : index
    %c0_10 = arith.constant 0 : index
    %7 = vector.load %arg3[%c1, %c0_9, %c0_10] : memref<5x20x128xbf16, #tpu.memory_space<vmem>>, vector<1x20x128xbf16>
    %8 = vector.shape_cast %7 : vector<1x20x128xbf16> to vector<20x128xbf16>
    %cst_11 = arith.constant dense<0.000000e+00> : vector<128x128xf32>
    %9 = tpu.matmul %6, %8, %cst_11 {dimension_numbers = #tpu.dot_dimension_numbers<[1], [0], [0], [1], [0, 0, 1, 1], [], []>} : vector<128x20xbf16>, vector<20x128xbf16>, vector<128x128xf32> -> vector<128x128xf32>
    %10 = arith.addf %4, %9 : vector<128x128xf32>
    %c0_12 = arith.constant 0 : index
    %c0_13 = arith.constant 0 : index
    %c32 = arith.constant 32 : index
    %c0_14 = arith.constant 0 : index
    %11 = vector.load %arg2[%c0_12, %c0_13, %c32, %c0_14] : memref<1x1x192x20xbf16, #tpu.memory_space<vmem>>, vector<1x1x128x20xbf16>
    %12 = vector.shape_cast %11 : vector<1x1x128x20xbf16> to vector<128x20xbf16>
    %c2 = arith.constant 2 : index
    %c0_15 = arith.constant 0 : index
    %c0_16 = arith.constant 0 : index
    %13 = vector.load %arg3[%c2, %c0_15, %c0_16] : memref<5x20x128xbf16, #tpu.memory_space<vmem>>, vector<1x20x128xbf16>
    %14 = vector.shape_cast %13 : vector<1x20x128xbf16> to vector<20x128xbf16>
    %cst_17 = arith.constant dense<0.000000e+00> : vector<128x128xf32>
    %15 = tpu.matmul %12, %14, %cst_17 {dimension_numbers = #tpu.dot_dimension_numbers<[1], [0], [0], [1], [0, 0, 1, 1], [], []>} : vector<128x20xbf16>, vector<20x128xbf16>, vector<128x128xf32> -> vector<128x128xf32>
    %16 = arith.addf %10, %15 : vector<128x128xf32>
    %c0_18 = arith.constant 0 : index
    %c0_19 = arith.constant 0 : index
    %c48 = arith.constant 48 : index
    %c0_20 = arith.constant 0 : index
    %17 = vector.load %arg2[%c0_18, %c0_19, %c48, %c0_20] : memref<1x1x192x20xbf16, #tpu.memory_space<vmem>>, vector<1x1x128x20xbf16>
    %18 = vector.shape_cast %17 : vector<1x1x128x20xbf16> to vector<128x20xbf16>
    %c3 = arith.constant 3 : index
    %c0_21 = arith.constant 0 : index
    %c0_22 = arith.constant 0 : index
    %19 = vector.load %arg3[%c3, %c0_21, %c0_22] : memref<5x20x128xbf16, #tpu.memory_space<vmem>>, vector<1x20x128xbf16>
    %20 = vector.shape_cast %19 : vector<1x20x128xbf16> to vector<20x128xbf16>
    %cst_23 = arith.constant dense<0.000000e+00> : vector<128x128xf32>
    %21 = tpu.matmul %18, %20, %cst_23 {dimension_numbers = #tpu.dot_dimension_numbers<[1], [0], [0], [1], [0, 0, 1, 1], [], []>} : vector<128x20xbf16>, vector<20x128xbf16>, vector<128x128xf32> -> vector<128x128xf32>
    %22 = arith.addf %16, %21 : vector<128x128xf32>
    %c0_24 = arith.constant 0 : index
    %c0_25 = arith.constant 0 : index
    %c64 = arith.constant 64 : index
    %c0_26 = arith.constant 0 : index
    %23 = vector.load %arg2[%c0_24, %c0_25, %c64, %c0_26] : memref<1x1x192x20xbf16, #tpu.memory_space<vmem>>, vector<1x1x128x20xbf16>
    %24 = vector.shape_cast %23 : vector<1x1x128x20xbf16> to vector<128x20xbf16>
    %c4 = arith.constant 4 : index
    %c0_27 = arith.constant 0 : index
    %c0_28 = arith.constant 0 : index
    %25 = vector.load %arg3[%c4, %c0_27, %c0_28] : memref<5x20x128xbf16, #tpu.memory_space<vmem>>, vector<1x20x128xbf16>
    %26 = vector.shape_cast %25 : vector<1x20x128xbf16> to vector<20x128xbf16>
    %cst_29 = arith.constant dense<0.000000e+00> : vector<128x128xf32>
    %27 = tpu.matmul %24, %26, %cst_29 {dimension_numbers = #tpu.dot_dimension_numbers<[1], [0], [0], [1], [0, 0, 1, 1], [], []>} : vector<128x20xbf16>, vector<20x128xbf16>, vector<128x128xf32> -> vector<128x128xf32>
    %28 = arith.addf %22, %27 : vector<128x128xf32>
    %c0_30 = arith.constant 0 : index
    %c0_31 = arith.constant 0 : index
    %29 = vector.load %arg4[%c0_30, %c0_31] : memref<1x128xf32, #tpu.memory_space<vmem>>, vector<1x128xf32>
    %30 = vector.broadcast %29 : vector<1x128xf32> to vector<128x128xf32>
    %31 = arith.addf %28, %30 : vector<128x128xf32>
    %c0_32 = arith.constant 0 : index
    %c0_33 = arith.constant 0 : index
    %c0_34 = arith.constant 0 : index
    %c0_35 = arith.constant 0 : index
    %32 = vector.load %arg5[%c0_32, %c0_33, %c0_34, %c0_35] : memref<1x1x128x128xf32, #tpu.memory_space<vmem>>, vector<1x1x128x128xf32>
    %33 = vector.shape_cast %32 : vector<1x1x128x128xf32> to vector<128x128xf32>
    %34 = vector.shape_cast %31 : vector<128x128xf32> to vector<1x1x128x128xf32>
    tpu.vector_store %arg5[%c0_32, %c0_33, %c0_34, %c0_35], %34 {strides = array<i32>} : memref<1x1x128x128xf32, #tpu.memory_space<vmem>>, vector<1x1x128x128xf32>,
    return
  }
  func.func @transform_0(%arg0: i32, %arg1: i32) -> (i32, i32, i32, i32) {
    %c0_i32 = arith.constant 0 : i32
    %c0_i32_0 = arith.constant 0 : i32
    %c0_i32_1 = arith.constant 0 : i32
    return %arg0, %arg1, %c0_i32, %c0_i32_0 : i32, i32, i32, i32
  }
  func.func @transform_1(%arg0: i32, %arg1: i32) -> (i32, i32, i32) {
    %c0_i32 = arith.constant 0 : i32
    %c0_i32_0 = arith.constant 0 : i32
    %c0_i32_1 = arith.constant 0 : i32
    %c0_i32_2 = arith.constant 0 : i32
    return %c0_i32, %c0_i32_0, %c0_i32_1 : i32, i32, i32
  }
  func.func @transform_2(%arg0: i32, %arg1: i32) -> (i32, i32) {
    %c0_i32 = arith.constant 0 : i32
    %c0_i32_0 = arith.constant 0 : i32
    %c0_i32_1 = arith.constant 0 : i32
    return %c0_i32, %c0_i32_0 : i32, i32
  }
  func.func @transform_3(%arg0: i32, %arg1: i32) -> (i32, i32, i32, i32) {
    %c0_i32 = arith.constant 0 : i32
    %c0_i32_0 = arith.constant 0 : i32
    %c0_i32_1 = arith.constant 0 : i32
    return %arg0, %arg1, %c0_i32, %c0_i32_0 : i32, i32, i32, i32
  }
}

</mosaic_0001>

<bundles_post_ra>
// kernel: inception_block.1
= control target key start
LH: loop header
LB: loop body
LE: loop exit
PB: predicated region body
PF: predicated region fallthrough
CT: control target
= control target key end

     0   :  { %s1762_s12 = smov 0   ;;  %s1764_s13 = smov 0   ;;  %s1995_s0 = inlined_call_operand.vmem [shape: bf16[2,2,192,20], index: 0, kind: input, shape index: {}]   ;;  %s1996_s1 = inlined_call_operand.vmem [shape: bf16[5,20,128], index: 1, kind: input, shape index: {}]   ;;  %s1997_s2 = inlined_call_operand.vmem [shape: f32[1,128], index: 2, kind: input, shape index: {}]   ;;  %s1998_s3 = inlined_call_operand.vmem [shape: f32[2,2,128,128], index: 3, kind: output, shape index: {}]  }
   0x1   :  { %s1766_s14 = smov 0   ;;  %s1768_s15 = smov 0  }
   0x2   :  { %s1770_s16 = smov 0  }
   0x3 LB: > { %s22_s17 = sadd.s32 1, %s1732_s14  ;;  %s25_s18 = sadd.s32 1, %s1736_s15  ;;  %s1740_s16 = sphi %s1770_s16, %s13_s16   ;;  %s1736_s15 = sphi %s1768_s15, %s2002_s15   ;;  %s1732_s14 = sphi %s1766_s14, %s2001_s14   ;;  %s1728_s13 = sphi %s1764_s13, %s2000_s13   ;;  %s1724_s12 = sphi %s1762_s12, %s1999_s12  }
   0x4   : > { %p23_p0 = scmp.ge.s32.totalorder %s22_s17, 2  ;;  %p1290_p1 = scmp.ge.s32.totalorder %s1740_s16, 1 }
   0x5   : > { %p157_p2 = scmp.lt.s32.totalorder %s1740_s16, 5 }
   0x6   : > { %s2004_s17 = smov (%p23_p0, %s22_s17), 0  ;;  %s2006_s18 = smov (!%p23_p0, %s25_s18), %s1736_s15 }
   0x7   : > { %p158_p3 = pnand %p1290_p1, %p157_p2  ;;  %p27_p4 = scmp.ge.s32.totalorder %s2006_s18, 2 }
   0x8   : > { %v1659_v0 = vld [vmem:[%s1996_s1 + $0xc] sm:$0xff] (!%p158_p3)   ;;  %vm307_vm0 = vcmask (!%p158_p3), 1041408   ;;  %v1800_v1 = vld [vmem:[%s1996_s1 + $0x18] sm:$0xff] (!%p158_p3)   ;;  %p189_p5 = scmp.lt.s32.totalorder (!%p158_p3), %s1728_s13, 1  ;;  %p191_p6 = scmp.lt.s32.totalorder (!%p158_p3), %s1724_s12, 1  ;;  %v1664_v5 = vld [vmem:[%s1996_s1] sm:$0xff] (!%p158_p3)  }
   0x9   : > { %s2008_s18 = smov (%p27_p4, %s2006_s18), 0  ;;  %161 = sbr.rel (%p158_p3) target bundleno = 317 (0x13d), region = 32 }
   0xa   : > { %1443 = vmatprep.subr.bf16.mxu1 (!%p158_p3), %v1659_v0  ;;  %v1661_v2 = vld [vmem:[%s1996_s1 + $0x14] ss:$0 sps:$4 sm:$0x33] (!%p158_p3)   ;;  %1483 = vmatprep.subr.bf16.mxu0 (!%p158_p3), %v1800_v1  ;;  %v1810_v3 = vld [vmem:[%s1996_s1 + $0x20] ss:$0 sps:$4 sm:$0x33] (!%p158_p3)  }
   0xb   : > { %1444 = vmatpush3.bf16.msra.mxu1 (!%p158_p3), %v1659_v0  ;;  %1484 = vmatpush3.bf16.msra.mxu0 (!%p158_p3), %v1800_v1  ;;  %v309_v4 = vsel (!%p158_p3), %vm307_vm0, %v1661_v2, 0  ;;  %v1827_v6 = vsel (!%p158_p3), %vm307_vm0, %v1810_v3, 0  ;;  %v1666_v7 = vld [vmem:[%s1996_s1 + $0x24] sm:$0xff] (!%p158_p3)   ;;  %vm282_vm1 = vcmask (!%p158_p3), 162816   ;;  %v1677_v16 = vld [vmem:[%s1996_s1 + $0x30] sm:$0xff] (!%p158_p3)  }
   0xc   : > { %1611 = vmatprep.subr.msk.bf16.mxu1 (!%p158_p3), %vm307_vm0, %v1661_v2  ;;  %1613 = vmatprep.subr.msk.bf16.mxu0 (!%p158_p3), %vm307_vm0, %v1810_v3  ;;  %v1675_v9 = vld [vmem:[%s1996_s1 + $0x8] ss:$0 sps:$4 sm:$0x33] (!%p158_p3)   ;;  %v1671_v11 = vld [vmem:[%s1996_s1 + $0x2c] ss:$0 sps:$4 sm:$0x33] (!%p158_p3)  }
   0xd   : > { %v426_v17 = vsel (!%p158_p3), %vm307_vm0, %v1675_v9, 0  ;;  %v828_v19 = vsel (!%p158_p3), %vm307_vm0, %v1671_v11, 0  ;;  %v1686_v26 = vld [vmem:[%s1996_s1 + $0x38] ss:$0 sps:$4 sm:$0x33] (!%p158_p3)  }
   0xe   : > { %v1037_v29 = vsel (!%p158_p3), %vm307_vm0, %v1686_v26, 0  ;;  %v1941_v57 = vld [vmem:[%s1997_s2] ss:$0 sm:$0xff] (!%p158_p3) }
   0xf   : > { %1446 = vmatpush3.bf16.msra.mxu1 (!%p158_p3), %v309_v4  ;;  %1486 = vmatpush3.bf16.msra.mxu0 (!%p158_p3), %v1827_v6 }
  0x10   : > { %s2010_s13 = smov (!%p189_p5, %s1728_s13), 1  ;;  %s2012_s12 = smov (!%p191_p6, %s1724_s12), 1  ;;  %1463 = vmatprep.subr.bf16.mxu1 %v1664_v5  ;;  %1503 = vmatprep.subr.bf16.mxu0 %v1666_v7 }
  0x11   : > { %s1618_s29 = smul.u32 48, %s2010_s13  ;;  %s1292_s26 = sshll.u32 %s2012_s12, 4 }
  0x12   : > { %s1617_s30 = smul.u32 24, %s2012_s12  ;;  %s1293_s27 = sshll.u32 %s2010_s13, 5 }
  0x13   : > { %s204_s28 = sadd.s32 %s1293_s27, %s1292_s26 }
  0x14   : > { %s195_s6 = sadd.s32 %s1618_s29, %s1617_s30  ;;  %s1294_s29 = sshll.u32 %s204_s28, 3 }
  0x15   : > { %s1291_s7 = sshll.u32 %s195_s6, 2 }
  0x16   : > { %s1838_s10 = scalar_lea.vmem %s1995_s0, %s1291_s7  ;;  %s1946_s7 = scalar_lea.vmem %s1998_s3, %s1294_s29 }
  0x17   : > { %v1663_v8 = vld [vmem:[%s1838_s10 + $0x8] sm:$0xff]   ;;  %v1665_v10 = vld [vmem:[%s1838_s10 + $0x10] sm:$0xff]   ;;  %v1668_v13 = vld [vmem:[%s1838_s10 + $0x18] sm:$0xff]  }
  0x18   : > { %1447 = vmatprep.mubr.msk.bf16.mxu1 %vm282_vm1, %v1663_v8  ;;  %v1667_v12 = vld [vmem:[%s1838_s10 + $0x10] sm:$0xff]   ;;  %1487 = vmatprep.mubr.msk.bf16.mxu0 %vm282_vm1, %v1665_v10  ;;  %v1669_v14 = vld [vmem:[%s1838_s10 + $0x18] sm:$0xff]   ;;  %v1670_v15 = vld [vmem:[%s1838_s10 + $0x20] sm:$0xff]  }
  0x19   : > { %1448 = vmatmul.mubr.msk.bf16.vlgmr.msra.gmra.mrb[0].mxu1 %vm282_vm1, %v1667_v12  ;;  %1488 = vmatmul.mubr.msk.bf16.vlgmr.msra.gmra.mrb[0].mxu0 %vm282_vm1, %v1668_v13  ;;  %v1672_v18 = vld [vmem:[%s1838_s10 + $0x20] sm:$0xff]   ;;  %v1673_v20 = vld [vmem:[%s1838_s10 + $0x28] sm:$0xff]   ;;  %v1676_v22 = vld [vmem:[%s1838_s10 + $0x18] sm:$0xff]  }
  0x1a   : > { %1464 = vmatpush3.bf16.msra.mxu1 %v1664_v5  ;;  %1504 = vmatpush3.bf16.msra.mxu0 %v1666_v7  ;;  %v1674_v21 = vld [vmem:[%s1838_s10 + $0x28] sm:$0xff]   ;;  %v1678_v23 = vld [vmem:[%s1838_s10 + $0x30] sm:$0xff]   ;;  %v1679_v24 = vld [vmem:[%s1838_s10 + $0x20] sm:$0xff]  }
  0x1b   : > { %1451 = vmatprep.mubr.msk.bf16.mxu1 %vm282_vm1, %v1669_v14  ;;  %1491 = vmatprep.mubr.msk.bf16.mxu0 %vm282_vm1, %v1670_v15  ;;  %v1680_v25 = vld [vmem:[%s1838_s10 + $0x38] sm:$0xff]   ;;  %v1681_v27 = vld [vmem:[%s1838_s10 + $0x28] sm:$0xff]   ;;  %v1682_v28 = vld [vmem:[%s1838_s10 + $0x40] sm:$0xff]  }
  0x1c   : > { %1615 = vmatprep.subr.msk.bf16.mxu0 %vm307_vm0, %v1671_v11  ;;  %1612 = vmatprep.subr.msk.bf16.mxu1 %vm307_vm0, %v1675_v9  ;;  %v1683_v30 = vld [vmem:[%s1838_s10 + $0x30] sm:$0xff]   ;;  %v1684_v31 = vld [vmem:[%s1838_s10] sm:$0xff]   ;;  %v1685_v32 = vld [vmem:[%s1838_s10 + $0x38] sm:$0xff]  }
  0x1d   : > { %v1687_v33 = vld [vmem:[%s1838_s10 + $0x40] sm:$0xff]   ;;  %v1688_v34 = vld [vmem:[%s1838_s10 + $0x48] sm:$0xff]   ;;  %v1689_v35 = vld [vmem:[%s1838_s10 + $0x50] sm:$0xff]  }
  0x1e   : > { %1466 = vmatpush3.bf16.msra.mxu1 %v426_v17  ;;  %1506 = vmatpush3.bf16.msra.mxu0 %v828_v19  ;;  %v1690_v36 = vld [vmem:[%s1838_s10 + $0x20] sm:$0xff]   ;;  %v1691_v37 = vld [vmem:[%s1838_s10 + $0x28] sm:$0xff]   ;;  %v1692_v38 = vld [vmem:[%s1838_s10 + $0x30] sm:$0xff]  }
  0x1f   : > { %1543 = vmatprep.subr.bf16.mxu1 %v1800_v1  ;;  %1523 = vmatprep.subr.bf16.mxu0 %v1677_v16  ;;  %v1693_v39 = vld [vmem:[%s1838_s10 + $0x38] sm:$0xff]   ;;  %v1694_v40 = vld [vmem:[%s1838_s10 + $0x30] sm:$0xff]   ;;  %v1695_v41 = vld [vmem:[%s1838_s10 + $0x40] sm:$0xff]  }
  0x20   : > { %v1696_v42 = vld [vmem:[%s1838_s10 + $0x38] sm:$0xff]   ;;  %v1697_v43 = vld [vmem:[%s1838_s10 + $0x48] sm:$0xff]   ;;  %v1698_v44 = vld [vmem:[%s1838_s10 + $0x40] sm:$0xff]  }
  0x21   : > { %1452 = vmatmul.mubr.msk.bf16.gmra.mrb[4].mxu1 %vm282_vm1, %v1672_v18  ;;  %1492 = vmatmul.mubr.msk.bf16.gmra.mrb[4].mxu0 %vm282_vm1, %v1673_v20  ;;  %v1699_v45 = vld [vmem:[%s1838_s10 + $0x50] sm:$0xff]   ;;  %v1700_v46 = vld [vmem:[%s1838_s10 + $0x48] sm:$0xff]   ;;  %v1701_v47 = vld [vmem:[%s1838_s10 + $0x58] sm:$0xff]  }
  0x22   : > { %1455 = vmatprep.mubr.msk.bf16.mxu1 %vm282_vm1, %v1674_v21  ;;  %1507 = vmatprep.mubr.msk.bf16.mxu0 %vm282_vm1, %v1676_v22 }
  0x29   : > { %1456 = vmatmul.mubr.msk.bf16.gmra.mrb[8].mxu1 %vm282_vm1, %v1678_v23  ;;  %1508 = vmatmul.mubr.msk.bf16.vlgmr.msra.gmra.mrb[0].mxu0 %vm282_vm1, %v1679_v24 }
  0x2a   : > { %1459 = vmatprep.mubr.msk.bf16.mxu1 %vm282_vm1, %v1680_v25  ;;  %1524 = vmatpush3.bf16.msra.mxu0 %v1677_v16 }
  0x2b   : > { %1511 = vmatprep.mubr.msk.bf16.mxu0 %vm282_vm1, %v1681_v27  ;;  %1616 = vmatprep.subr.msk.bf16.mxu0 %vm307_vm0, %v1686_v26 }
  0x2e   : > { %1526 = vmatpush3.bf16.msra.mxu0 %v1037_v29 }
  0x31   : > { %1460 = vmatmul.mubr.msk.bf16.gmra.mrb[12].mxu1 %vm282_vm1, %v1682_v28  ;;  %1512 = vmatmul.mubr.msk.bf16.gmra.mrb[4].mxu0 %vm282_vm1, %v1683_v30 }
  0x32   : > { %1467 = vmatprep.mubr.msk.bf16.mxu1 %vm282_vm1, %v1684_v31  ;;  %1515 = vmatprep.mubr.msk.bf16.mxu0 %vm282_vm1, %v1685_v32 }
  0x39   : > { %1468 = vmatmul.mubr.msk.bf16.vlgmr.msra.gmra.mrb[0].mxu1 %vm282_vm1, %v1663_v8  ;;  %1516 = vmatmul.mubr.msk.bf16.gmra.mrb[8].mxu0 %vm282_vm1, %v1687_v33 }
  0x3a   : > { %1545 = vmatpush3.bf16.msra.mxu1 %v1800_v1  ;;  %1471 = vmatprep.mubr.msk.bf16.mxu1 %vm282_vm1, %v1667_v12 }
  0x3b   : > { %1519 = vmatprep.mubr.msk.bf16.mxu0 %vm282_vm1, %v1688_v34  ;;  %1614 = vmatprep.subr.msk.bf16.mxu1 %vm307_vm0, %v1810_v3 }
  0x3e   : > { %1546 = vmatpush3.bf16.msra.mxu1 %v1827_v6 }
  0x41   : > { %1472 = vmatmul.mubr.msk.bf16.gmra.mrb[4].mxu1 %vm282_vm1, %v1669_v14  ;;  %1520 = vmatmul.mubr.msk.bf16.gmra.mrb[12].mxu0 %vm282_vm1, %v1689_v35 }
  0x42   : > { %1475 = vmatprep.mubr.msk.bf16.mxu1 %vm282_vm1, %v1672_v18  ;;  %1527 = vmatprep.mubr.msk.bf16.mxu0 %vm282_vm1, %v1690_v36 }
  0x49   : > { %1476 = vmatmul.mubr.msk.bf16.gmra.mrb[8].mxu1 %vm282_vm1, %v1674_v21  ;;  %1528 = vmatmul.mubr.msk.bf16.vlgmr.msra.gmra.mrb[0].mxu0 %vm282_vm1, %v1691_v37 }
  0x4a   : > { %1479 = vmatprep.mubr.msk.bf16.mxu1 %vm282_vm1, %v1678_v23  ;;  %1531 = vmatprep.mubr.msk.bf16.mxu0 %vm282_vm1, %v1692_v38 }
  0x51   : > { %1480 = vmatmul.mubr.msk.bf16.gmra.mrb[12].mxu1 %vm282_vm1, %v1680_v25  ;;  %1532 = vmatmul.mubr.msk.bf16.gmra.mrb[4].mxu0 %vm282_vm1, %v1693_v39 }
  0x52   : > { %1495 = vmatprep.mubr.msk.bf16.mxu1 %vm282_vm1, %v1694_v40  ;;  %1535 = vmatprep.mubr.msk.bf16.mxu0 %vm282_vm1, %v1695_v41 }
  0x59   : > { %1496 = vmatmul.mubr.msk.bf16.vlgmr.msra.gmra.mrb[8].mxu1 %vm282_vm1, %v1696_v42  ;;  %1536 = vmatmul.mubr.msk.bf16.gmra.mrb[8].mxu0 %vm282_vm1, %v1697_v43 }
  0x5a   : > { %1499 = vmatprep.mubr.msk.bf16.mxu1 %vm282_vm1, %v1698_v44  ;;  %1539 = vmatprep.mubr.msk.bf16.mxu0 %vm282_vm1, %v1699_v45 }
  0x61   : > { %1500 = vmatmul.mubr.msk.bf16.gmra.mrb[12].mxu1 %vm282_vm1, %v1700_v46  ;;  %1540 = vmatmul.mubr.msk.bf16.gmra.mrb[12].mxu0 %vm282_vm1, %v1701_v47 }
 0x10c   : > { %v1469_v48 = vpop.f32.mrb[0].mxu1 }
 0x10d   : > { %v462_v49 = vpop.f32.mrb[1].mxu1 }
 0x10e   : > { %v1470_v50 = vpop.f32.mrb[2].mxu1 }
 0x10f   : > { %v465_v51 = vpop.f32.mrb[3].mxu1 }
 0x114   : > { %v1473_v52 = vpop.f32.mrb[4].mxu1 }
 0x115   : > { %v478_v53 = vpop.f32.mrb[5].mxu1 }
 0x116   : > { %v1474_v54 = vpop.f32.mrb[6].mxu1 }
 0x117   : > { %v481_v55 = vpop.f32.mrb[7].mxu1 }
 0x11c   : > { %v1529_v56 = vpop.f32.mrb[0].mxu0 }
 0x11d   : > { %v1547_v58 = vadd.f32 %v1529_v56, %v1469_v48  ;;  %v1073_v59 = vpop.f32.mrb[1].mxu0 }
 0x11e   : > { %v1548_v60 = vadd.f32 %v1073_v59, %v462_v49  ;;  %v1530_v61 = vpop.f32.mrb[2].mxu0 }
 0x11f   : > { %v1161_v62 = vadd.f32 %v1547_v58, %v1941_v57  ;;  %v1549_v63 = vadd.f32 %v1530_v61, %v1470_v50  ;;  %v1076_v0 = vpop.f32.mrb[3].mxu0 }
 0x120   : > { %v1159_v1 = vadd.f32 %v1548_v60, %v1941_v57  ;;  %v1550_v2 = vadd.f32 %v1076_v0, %v465_v51 }
 0x121   : > { %1177 = vst [vmem:[%s1946_s7 + $0x10] sm:$0xff] %v1161_v62  ;;  %v1162_v3 = vadd.f32 %v1549_v63, %v1941_v57 }
 0x122   : > { %1175 = vst [vmem:[%s1946_s7] sm:$0xff] %v1159_v1  ;;  %v1160_v4 = vadd.f32 %v1550_v2, %v1941_v57 }
 0x123   : > { %1178 = vst [vmem:[%s1946_s7 + $0x18] sm:$0xff] %v1162_v3 }
 0x124   : > { %1176 = vst [vmem:[%s1946_s7 + $0x8] sm:$0xff] %v1160_v4  ;;  %v1533_v5 = vpop.f32.mrb[4].mxu0 }
 0x125   : > { %v1551_v6 = vadd.f32 %v1533_v5, %v1473_v52  ;;  %v1089_v7 = vpop.f32.mrb[5].mxu0 }
 0x126   : > { %v1552_v8 = vadd.f32 %v1089_v7, %v478_v53  ;;  %v1534_v9 = vpop.f32.mrb[6].mxu0 }
 0x127   : > { %v1165_v10 = vadd.f32 %v1551_v6, %v1941_v57  ;;  %v1553_v11 = vadd.f32 %v1534_v9, %v1474_v54  ;;  %v1092_v12 = vpop.f32.mrb[7].mxu0 }
 0x128   : > { %v1163_v13 = vadd.f32 %v1552_v8, %v1941_v57  ;;  %v1554_v14 = vadd.f32 %v1092_v12, %v481_v55 }
 0x129   : > { %1181 = vst [vmem:[%s1946_s7 + $0x30] sm:$0xff] %v1165_v10  ;;  %v1166_v15 = vadd.f32 %v1553_v11, %v1941_v57 }
 0x12a   : > { %1179 = vst [vmem:[%s1946_s7 + $0x20] sm:$0xff] %v1163_v13  ;;  %v1164_v16 = vadd.f32 %v1554_v14, %v1941_v57 }
 0x12b   : > { %1182 = vst [vmem:[%s1946_s7 + $0x38] sm:$0xff] %v1166_v15 }
 0x12c   : > { %v1497_v17 = vpop.f32.mrb[8].mxu1  ;;  %1180 = vst [vmem:[%s1946_s7 + $0x28] sm:$0xff] %v1164_v16  ;;  %v1537_v18 = vpop.f32.mrb[8].mxu0 }
 0x12d   : > { %v687_v19 = vpop.f32.mrb[9].mxu1  ;;  %v1555_v20 = vadd.f32 %v1537_v18, %v1497_v17  ;;  %v1105_v21 = vpop.f32.mrb[9].mxu0 }
 0x12e   : > { %v1498_v22 = vpop.f32.mrb[10].mxu1  ;;  %v1556_v23 = vadd.f32 %v1105_v21, %v687_v19  ;;  %v1538_v24 = vpop.f32.mrb[10].mxu0 }
 0x12f   : > { %v690_v25 = vpop.f32.mrb[11].mxu1  ;;  %v1169_v26 = vadd.f32 %v1555_v20, %v1941_v57  ;;  %v1557_v27 = vadd.f32 %v1538_v24, %v1498_v22  ;;  %v1108_v28 = vpop.f32.mrb[11].mxu0 }
 0x130   : > { %v1167_v29 = vadd.f32 %v1556_v23, %v1941_v57  ;;  %v1558_v30 = vadd.f32 %v1108_v28, %v690_v25 }
 0x131   : > { %1185 = vst [vmem:[%s1946_s7 + $0x50] sm:$0xff] %v1169_v26  ;;  %v1170_v31 = vadd.f32 %v1557_v27, %v1941_v57 }
 0x132   : > { %1183 = vst [vmem:[%s1946_s7 + $0x40] sm:$0xff] %v1167_v29  ;;  %v1168_v32 = vadd.f32 %v1558_v30, %v1941_v57 }
 0x133   : > { %1186 = vst [vmem:[%s1946_s7 + $0x58] sm:$0xff] %v1170_v31 }
 0x134   : > { %v1501_v33 = vpop.f32.mrb[12].mxu1  ;;  %1184 = vst [vmem:[%s1946_s7 + $0x48] sm:$0xff] %v1168_v32  ;;  %v1541_v34 = vpop.f32.mrb[12].mxu0 }
 0x135   : > { %v703_v35 = vpop.f32.mrb[13].mxu1  ;;  %v1559_v36 = vadd.f32 %v1541_v34, %v1501_v33  ;;  %v1121_v37 = vpop.f32.mrb[13].mxu0 }
 0x136   : > { %v1502_v38 = vpop.f32.mrb[14].mxu1  ;;  %v1560_v39 = vadd.f32 %v1121_v37, %v703_v35  ;;  %v1542_v40 = vpop.f32.mrb[14].mxu0 }
 0x137   : > { %v706_v41 = vpop.f32.mrb[15].mxu1  ;;  %v1173_v42 = vadd.f32 %v1559_v36, %v1941_v57  ;;  %v1561_v43 = vadd.f32 %v1542_v40, %v1502_v38  ;;  %v1124_v44 = vpop.f32.mrb[15].mxu0 }
 0x138   : > { %v1171_v45 = vadd.f32 %v1560_v39, %v1941_v57  ;;  %v1562_v46 = vadd.f32 %v1124_v44, %v706_v41 }
 0x139   : > { %1189 = vst [vmem:[%s1946_s7 + $0x70] sm:$0xff] %v1173_v42  ;;  %v1174_v47 = vadd.f32 %v1561_v43, %v1941_v57 }
 0x13a   : > { %1187 = vst [vmem:[%s1946_s7 + $0x60] sm:$0xff] %v1171_v45  ;;  %v1172_v48 = vadd.f32 %v1562_v46, %v1941_v57 }
 0x13b   : > { %1190 = vst [vmem:[%s1946_s7 + $0x78] sm:$0xff] %v1174_v47 }
 0x13c   : > { %1188 = vst [vmem:[%s1946_s7 + $0x68] sm:$0xff] %v1172_v48 }
 0x13d PF: > { %s13_s16 = sadd.s32 1, %s1740_s16   ;;  %s1999_s12 = smov %s1732_s14 }
 0x13e   : > { %p10_p7 = scmp.ge.s32.totalorder %s13_s16, 6   ;;  %s2000_s13 = smov %s1736_s15 }
 0x13f   : > { %s2001_s14 = smov %s2004_s17  ;;  %s2002_s15 = smov %s2008_s18 }
 0x140   :  { %12 = sbr.rel (!%p10_p7) target bundleno = 3 (0x3), region = 66 }

</bundles_post_ra>
